<compile_context>
chip_gen: v7x
topology: tpu7x:2x2x1
jax: 0.10.0
libtpu: 0.0.40
codegen_flags: <defaults>
</compile_context>

<pallas_src>
import functools

import jax
import jax.numpy as jnp
from jax.experimental import pallas as pl
from jax.experimental.pallas import tpu as pltpu


def _round_up(x, m):
    return ((x + m - 1) // m) * m


def _policy_kernel(x_ref, w1_ref, w2_ref, w3_ref, w4_ref, b_ref, out_ref,
                   *, hp, ap):
    """One batch tile.

    x_ref : (tile_b, num_inputs)  -- raw (un-padded) feature width.
    w1_ref: (num_inputs, hp)      w2_ref: (hp, hp)
    w3_ref: [W3e | W3i | W3n] fused along N, segments at 0, hp, 2*hp.
    w4_ref: block-diag [[W4e, 0], [0, W4i]] over (2*hp, 2*ap).
    b_ref : row 0 = b1, row 1 = b2, row 2 = [b3e|b3i|b3n], row 3 = [b4e|b4i].
    out_ref: (tile_b, 3*ap) -> lanes [epochs | impact | noise].
    """
    relu = lambda v: jnp.maximum(v, 0.0)

    x = x_ref[...]

    b1 = b_ref[0:1, :hp]
    b2 = b_ref[1:2, :hp]
    b3 = b_ref[2:3, :]                       # width 2*hp + ap
    b4 = b_ref[3:4, :2 * ap]

    # trunk
    h = relu(jnp.dot(x, w1_ref[...], preferred_element_type=jnp.float32) + b1)
    h = relu(jnp.dot(h, w2_ref[...], preferred_element_type=jnp.float32) + b2)

    # fused head-3: [relu(l3e(x)) | relu(l3i(x)) | relu(l3n(x))]
    h3 = relu(jnp.dot(h, w3_ref[...], preferred_element_type=jnp.float32) + b3)

    # fused head-4: input is the contiguous [e3 | i3] segment of h3,
    # weight is block-diagonal -> [relu(l4e(e3)) | relu(l4i(i3))]
    h4 = relu(jnp.dot(h3[:, :2 * hp], w4_ref[...],
                      preferred_element_type=jnp.float32) + b4)

    # one fused sigmoid + one wide lane-dense store: [epochs | impact | noise]
    pre = jnp.concatenate([h4, h3[:, 2 * hp:]], axis=-1)   # (tile_b, 3*ap)
    out_ref[...] = jax.nn.sigmoid(pre).astype(out_ref.dtype)


def pack_params(params, num_inputs, hidden, num_actions, dtype=jnp.float32):
    """Pad / fuse raw (in, out) weights into lane-dense kernel operands.

    dtype=jnp.bfloat16 halves weight DMA bytes and MXU passes on v6e/v7x
    (at reduced precision); default f32 keeps bit-exact-ish reference parity.
    """
    hp = _round_up(hidden, 128)
    ap = _round_up(num_actions, 128)

    # w1 keeps its raw K (= num_inputs); only the output lanes are padded.
    w1 = jnp.zeros((num_inputs, hp), dtype).at[:, :hidden].set(
        params["w1"].astype(dtype))
    w2 = jnp.zeros((hp, hp), dtype).at[:hidden, :hidden].set(
        params["w2"].astype(dtype))

    # fused head-3 weight: segments lane-aligned at 0, hp, 2*hp
    w3 = jnp.zeros((hp, 2 * hp + ap), dtype)
    w3 = w3.at[:hidden, 0:hidden].set(params["w3e"].astype(dtype))
    w3 = w3.at[:hidden, hp:hp + hidden].set(params["w3i"].astype(dtype))
    w3 = w3.at[:hidden, 2 * hp:2 * hp + num_actions].set(
        params["w3n"].astype(dtype))

    # fused head-4 weight: block-diagonal
    w4 = jnp.zeros((2 * hp, 2 * ap), dtype)
    w4 = w4.at[:hidden, 0:num_actions].set(params["w4e"].astype(dtype))
    w4 = w4.at[hp:hp + hidden, ap:ap + num_actions].set(
        params["w4i"].astype(dtype))

    # all biases packed into a single lane-dense operand
    bw = 2 * hp + ap
    bias = jnp.zeros((4, bw), jnp.float32)
    bias = bias.at[0, :hidden].set(params["b1"])
    bias = bias.at[1, :hidden].set(params["b2"])
    bias = bias.at[2, 0:hidden].set(params["b3e"])
    bias = bias.at[2, hp:hp + hidden].set(params["b3i"])
    bias = bias.at[2, 2 * hp:2 * hp + num_actions].set(params["b3n"])
    bias = bias.at[3, 0:num_actions].set(params["b4e"])
    bias = bias.at[3, ap:ap + num_actions].set(params["b4i"])

    return dict(w1=w1, w2=w2, w3=w3, w4=w4, bias=bias,
                dims=(num_inputs, hidden, num_actions, hp, ap))


@functools.partial(jax.jit, static_argnames=("dims",))
def _forward_impl(state, w1, w2, w3, w4, bias, *, dims):
    num_inputs, hidden, num_actions, hp, ap = dims
    B = state.shape[0]

    # Batch tiling:
    #   * B <= 512            -> one tile, grid=(1,): zero per-step overhead,
    #                            optimal for v5e/v6e (single TensorCore).
    #   * B  > 512            -> ~B/2 per tile (8-aligned, capped at 1024) so
    #                            v7x's two TensorCores each get a full tile
    #                            under dimension_semantics=("parallel",).
    b_al = _round_up(B, 8)
    if b_al <= 512:
        tile_b = b_al
    else:
        tile_b = min(_round_up((b_al + 1) // 2, 8), 1024)
    bpad = _round_up(b_al, tile_b)
    grid = (bpad // tile_b,)

    # Batch-only padding (num_inputs lanes stay raw; Mosaic pads K in-matmul).
    xs = state if bpad == B else jnp.pad(state, ((0, bpad - B), (0, 0)))

    kernel = functools.partial(_policy_kernel, hp=hp, ap=ap)

    # NOTE: weight/bias blocks have constant index_maps; default double
    # buffering costs ~0.6 MiB VMEM which is far below any generation's
    # limit, so we accept the default rather than force Buffered(1).
    out = pl.pallas_call(
        kernel,
        out_shape=jax.ShapeDtypeStruct((bpad, 3 * ap), jnp.float32),
        grid=grid,
        in_specs=[
            pl.BlockSpec((tile_b, num_inputs), lambda i: (i, 0)),
            pl.BlockSpec(w1.shape, lambda i: (0, 0)),
            pl.BlockSpec(w2.shape, lambda i: (0, 0)),
            pl.BlockSpec(w3.shape, lambda i: (0, 0)),
            pl.BlockSpec(w4.shape, lambda i: (0, 0)),
            pl.BlockSpec(bias.shape, lambda i: (0, 0)),
        ],
        out_specs=pl.BlockSpec((tile_b, 3 * ap), lambda i: (i, 0)),
        compiler_params=pltpu.CompilerParams(
            dimension_semantics=("parallel",)),
    )(xs, w1, w2, w3, w4, bias)

    # torch.cat([epochs, impact, noise], dim=0); pad stripped. This epilogue
    # lives inside the same jit as the kernel, so XLA fuses it with the copy
    # out of the pallas_call instead of an extra HBM round trip.
    out = out[:B].reshape(B, 3, ap)
    out = jnp.swapaxes(out, 0, 1)[:, :, :num_actions]       # (3, B, A)
    return out.reshape(3 * B, num_actions)


def policy_network_forward(state, packed):
    """state: (B, num_inputs) f32. Returns (3*B, num_actions) f32."""
    return _forward_impl(state, packed["w1"], packed["w2"], packed["w3"],
                         packed["w4"], packed["bias"], dims=packed["dims"])


def init_params(key, num_inputs, num_actions, hidden_size, init_w=0.1):
    """Mimics the PyTorch module's __init__. Weights stored as (in, out)."""
    keys = jax.random.split(key, 16)

    def linear_default(kw, kb, fan_in, fan_out):
        bound = 1.0 / jnp.sqrt(fan_in)
        w = jax.random.uniform(kw, (fan_in, fan_out), jnp.float32, -bound, bound)
        b = jax.random.uniform(kb, (fan_out,), jnp.float32, -bound, bound)
        return w, b

    def linear_initw(kw, kb, fan_in, fan_out):
        w = jax.random.uniform(kw, (fan_in, fan_out), jnp.float32, -init_w, init_w)
        b = jax.random.uniform(kb, (fan_out,), jnp.float32, -init_w, init_w)
        return w, b

    p = {}
    p["w1"], p["b1"] = linear_default(keys[0], keys[1], num_inputs, hidden_size)
    p["w2"], p["b2"] = linear_default(keys[2], keys[3], hidden_size, hidden_size)
    p["w3e"], p["b3e"] = linear_default(keys[4], keys[5], hidden_size, hidden_size)
    p["w4e"], p["b4e"] = linear_initw(keys[6], keys[7], hidden_size, num_actions)
    p["w3i"], p["b3i"] = linear_default(keys[8], keys[9], hidden_size, hidden_size)
    p["w4i"], p["b4i"] = linear_initw(keys[10], keys[11], hidden_size, num_actions)
    p["w3n"], p["b3n"] = linear_initw(keys[12], keys[13], hidden_size, num_actions)
    return p


def _reference_forward(state, p):
    relu = lambda v: jnp.maximum(v, 0.0)
    sig = jax.nn.sigmoid
    x = relu(state @ p["w1"] + p["b1"])
    x = relu(x @ p["w2"] + p["b2"])
    e = sig(relu(relu(x @ p["w3e"] + p["b3e"]) @ p["w4e"] + p["b4e"]))
    i = sig(relu(relu(x @ p["w3i"] + p["b3i"]) @ p["w4i"] + p["b4i"]))
    n = sig(relu(x @ p["w3n"] + p["b3n"]))
    return jnp.concatenate([e, i, n], axis=0)


if __name__ == "__main__":
    key = jax.random.PRNGKey(0)
    k_param, k_state = jax.random.split(key)

    batch = 2
    num_inputs = 16
    hidden_size = 32
    num_actions = 8

    params = init_params(k_param, num_inputs, num_actions, hidden_size)
    packed = pack_params(params, num_inputs, hidden_size, num_actions)
    state = jax.random.normal(k_state, (batch, num_inputs), dtype=jnp.float32)

    out = policy_network_forward(state, packed)
    out = jax.block_until_ready(out)

    ref = _reference_forward(state, params)
    assert out.shape == (3 * batch, num_actions), out.shape
    assert jnp.allclose(out, ref, atol=1e-5, rtol=1e-5), "mismatch vs reference"

    # NOTE: sigmoid(relu(.)) in the epochs/impact heads clamps outputs to
    # [0.5, 1); this mirrors the PyTorch module's semantics on purpose.
    print("KERNEL_OK")
</pallas_src>

<mosaic_0001>
module attributes {stable_mosaic.version = 11 : i64} {
  func.func @_policy_kernel(%arg0: i32, %arg1: memref<8x16xf32, #tpu.memory_space<vmem>>, %arg2: memref<16x128xf32, #tpu.memory_space<vmem>>, %arg3: memref<128x128xf32, #tpu.memory_space<vmem>>, %arg4: memref<128x384xf32, #tpu.memory_space<vmem>>, %arg5: memref<256x256xf32, #tpu.memory_space<vmem>>, %arg6: memref<4x384xf32, #tpu.memory_space<vmem>>, %arg7: memref<8x384xf32, #tpu.memory_space<vmem>>) attributes {dimension_semantics = [#tpu.dimension_semantics<parallel>], iteration_bounds = array<i64: 1>, scalar_prefetch = 0 : i64, scratch_operands = 0 : i64, tpu.core_type = #tpu.core_type<tc>, window_params = [{transform_indices = @transform_0, window_bounds = array<i64: 8, 16>}, {pipeline_mode = #tpu.pipeline_mode<synchronous>, transform_indices = @transform_1, window_bounds = array<i64: 16, 128>}, {pipeline_mode = #tpu.pipeline_mode<synchronous>, transform_indices = @transform_2, window_bounds = array<i64: 128, 128>}, {pipeline_mode = #tpu.pipeline_mode<synchronous>, transform_indices = @transform_3, window_bounds = array<i64: 128, 384>}, {pipeline_mode = #tpu.pipeline_mode<synchronous>, transform_indices = @transform_4, window_bounds = array<i64: 256, 256>}, {pipeline_mode = #tpu.pipeline_mode<synchronous>, transform_indices = @transform_5, window_bounds = array<i64: 4, 384>}, {transform_indices = @transform_6, window_bounds = array<i64: 8, 384>}]} {
    %c0 = arith.constant 0 : index
    %c0_0 = arith.constant 0 : index
    %0 = vector.load %arg1[%c0, %c0_0] : memref<8x16xf32, #tpu.memory_space<vmem>>, vector<8x16xf32>
    %c0_1 = arith.constant 0 : index
    %c0_2 = arith.constant 0 : index
    %1 = vector.load %arg6[%c0_1, %c0_2] : memref<4x384xf32, #tpu.memory_space<vmem>>, vector<1x128xf32>
    %c1 = arith.constant 1 : index
    %c0_3 = arith.constant 0 : index
    %2 = vector.load %arg6[%c1, %c0_3] : memref<4x384xf32, #tpu.memory_space<vmem>>, vector<1x128xf32>
    %c2 = arith.constant 2 : index
    %c0_4 = arith.constant 0 : index
    %3 = vector.load %arg6[%c2, %c0_4] : memref<4x384xf32, #tpu.memory_space<vmem>>, vector<1x384xf32>
    %c3 = arith.constant 3 : index
    %c0_5 = arith.constant 0 : index
    %4 = vector.load %arg6[%c3, %c0_5] : memref<4x384xf32, #tpu.memory_space<vmem>>, vector<1x256xf32>
    %c0_6 = arith.constant 0 : index
    %c0_7 = arith.constant 0 : index
    %5 = vector.load %arg2[%c0_6, %c0_7] : memref<16x128xf32, #tpu.memory_space<vmem>>, vector<16x128xf32>
    %cst = arith.constant dense<0.000000e+00> : vector<8x128xf32>
    %6 = tpu.matmul %0, %5, %cst {dimension_numbers = #tpu.dot_dimension_numbers<[1], [0], [0], [1], [0, 0, 1, 1], [], []>} : vector<8x16xf32>, vector<16x128xf32>, vector<8x128xf32> -> vector<8x128xf32>
    %7 = vector.broadcast %1 : vector<1x128xf32> to vector<8x128xf32>
    %8 = arith.addf %6, %7 : vector<8x128xf32>
    %cst_8 = arith.constant 0.000000e+00 : f32
    %9 = vector.broadcast %cst_8 : f32 to vector<8x128xf32>
    %10 = arith.maximumf %8, %9 : vector<8x128xf32>
    %c0_9 = arith.constant 0 : index
    %c0_10 = arith.constant 0 : index
    %11 = vector.load %arg3[%c0_9, %c0_10] : memref<128x128xf32, #tpu.memory_space<vmem>>, vector<128x128xf32>
    %cst_11 = arith.constant dense<0.000000e+00> : vector<8x128xf32>
    %12 = tpu.matmul %10, %11, %cst_11 {dimension_numbers = #tpu.dot_dimension_numbers<[1], [0], [0], [1], [0, 0, 1, 1], [], []>} : vector<8x128xf32>, vector<128x128xf32>, vector<8x128xf32> -> vector<8x128xf32>
    %13 = vector.broadcast %2 : vector<1x128xf32> to vector<8x128xf32>
    %14 = arith.addf %12, %13 : vector<8x128xf32>
    %cst_12 = arith.constant 0.000000e+00 : f32
    %15 = vector.broadcast %cst_12 : f32 to vector<8x128xf32>
    %16 = arith.maximumf %14, %15 : vector<8x128xf32>
    %c0_13 = arith.constant 0 : index
    %c0_14 = arith.constant 0 : index
    %17 = vector.load %arg4[%c0_13, %c0_14] : memref<128x384xf32, #tpu.memory_space<vmem>>, vector<128x384xf32>
    %cst_15 = arith.constant dense<0.000000e+00> : vector<8x384xf32>
    %18 = tpu.matmul %16, %17, %cst_15 {dimension_numbers = #tpu.dot_dimension_numbers<[1], [0], [0], [1], [0, 0, 1, 1], [], []>} : vector<8x128xf32>, vector<128x384xf32>, vector<8x384xf32> -> vector<8x384xf32>
    %19 = vector.broadcast %3 : vector<1x384xf32> to vector<8x384xf32>
    %20 = arith.addf %18, %19 : vector<8x384xf32>
    %cst_16 = arith.constant 0.000000e+00 : f32
    %21 = vector.broadcast %cst_16 : f32 to vector<8x384xf32>
    %22 = arith.maximumf %20, %21 : vector<8x384xf32>
    %23 = vector.extract_strided_slice %22 {offsets = [0, 0], sizes = [8, 256], strides = [1, 1]} : vector<8x384xf32> to vector<8x256xf32>
    %c0_17 = arith.constant 0 : index
    %c0_18 = arith.constant 0 : index
    %24 = vector.load %arg5[%c0_17, %c0_18] : memref<256x256xf32, #tpu.memory_space<vmem>>, vector<256x256xf32>
    %cst_19 = arith.constant dense<0.000000e+00> : vector<8x256xf32>
    %25 = tpu.matmul %23, %24, %cst_19 {dimension_numbers = #tpu.dot_dimension_numbers<[1], [0], [0], [1], [0, 0, 1, 1], [], []>} : vector<8x256xf32>, vector<256x256xf32>, vector<8x256xf32> -> vector<8x256xf32>
    %26 = vector.broadcast %4 : vector<1x256xf32> to vector<8x256xf32>
    %27 = arith.addf %25, %26 : vector<8x256xf32>
    %cst_20 = arith.constant 0.000000e+00 : f32
    %28 = vector.broadcast %cst_20 : f32 to vector<8x256xf32>
    %29 = arith.maximumf %27, %28 : vector<8x256xf32>
    %30 = vector.extract_strided_slice %22 {offsets = [0, 256], sizes = [8, 128], strides = [1, 1]} : vector<8x384xf32> to vector<8x128xf32>
    %31 = tpu.concatenate %29, %30 in 1 : vector<8x256xf32>, vector<8x128xf32> -> vector<8x384xf32>
    %32 = arith.negf %31 : vector<8x384xf32>
    %33 = math.exp %32 : vector<8x384xf32>
    %cst_21 = arith.constant 1.000000e+00 : f32
    %34 = vector.broadcast %cst_21 : f32 to vector<8x384xf32>
    %35 = arith.addf %34, %33 : vector<8x384xf32>
    %36 = arith.divf %34, %35 : vector<8x384xf32>
    %c0_22 = arith.constant 0 : index
    %c0_23 = arith.constant 0 : index
    %37 = vector.load %arg7[%c0_22, %c0_23] : memref<8x384xf32, #tpu.memory_space<vmem>>, vector<8x384xf32>
    tpu.vector_store %arg7[%c0_22, %c0_23], %36 {strides = array<i32>} : memref<8x384xf32, #tpu.memory_space<vmem>>, vector<8x384xf32>,
    return
  }
  func.func @transform_0(%arg0: i32) -> (i32, i32) {
    %c0_i32 = arith.constant 0 : i32
    %c0_i32_0 = arith.constant 0 : i32
    return %arg0, %c0_i32 : i32, i32
  }
  func.func @transform_1(%arg0: i32) -> (i32, i32) {
    %c0_i32 = arith.constant 0 : i32
    %c0_i32_0 = arith.constant 0 : i32
    %c0_i32_1 = arith.constant 0 : i32
    return %c0_i32, %c0_i32_0 : i32, i32
  }
  func.func @transform_2(%arg0: i32) -> (i32, i32) {
    %c0_i32 = arith.constant 0 : i32
    %c0_i32_0 = arith.constant 0 : i32
    %c0_i32_1 = arith.constant 0 : i32
    return %c0_i32, %c0_i32_0 : i32, i32
  }
  func.func @transform_3(%arg0: i32) -> (i32, i32) {
    %c0_i32 = arith.constant 0 : i32
    %c0_i32_0 = arith.constant 0 : i32
    %c0_i32_1 = arith.constant 0 : i32
    return %c0_i32, %c0_i32_0 : i32, i32
  }
  func.func @transform_4(%arg0: i32) -> (i32, i32) {
    %c0_i32 = arith.constant 0 : i32
    %c0_i32_0 = arith.constant 0 : i32
    %c0_i32_1 = arith.constant 0 : i32
    return %c0_i32, %c0_i32_0 : i32, i32
  }
  func.func @transform_5(%arg0: i32) -> (i32, i32) {
    %c0_i32 = arith.constant 0 : i32
    %c0_i32_0 = arith.constant 0 : i32
    %c0_i32_1 = arith.constant 0 : i32
    return %c0_i32, %c0_i32_0 : i32, i32
  }
  func.func @transform_6(%arg0: i32) -> (i32, i32) {
    %c0_i32 = arith.constant 0 : i32
    %c0_i32_0 = arith.constant 0 : i32
    return %arg0, %c0_i32 : i32, i32
  }
}

</mosaic_0001>

<bundles_post_ra>
// kernel: _forward_impl.1
= control target key start
LH: loop header
LB: loop body
LE: loop exit
PB: predicated region body
PF: predicated region fallthrough
CT: control target
= control target key end

     0   :  { %11 = vsyncpa [#allocation3], 0  ;;  %s1180_s0 = inlined_call_operand.vmem [shape: f32[8,16], index: 0, kind: input, shape index: {}]   ;;  %s1181_s1 = inlined_call_operand.hbm [shape: f32[16,128], index: 1, kind: input, shape index: {}]   ;;  %s1182_s2 = inlined_call_operand.hbm [shape: f32[128,128], index: 2, kind: input, shape index: {}]   ;;  %s1183_s3 = inlined_call_operand.hbm [shape: f32[128,384], index: 3, kind: input, shape index: {}]   ;;  %s1184_s4 = inlined_call_operand.hbm [shape: f32[256,256], index: 4, kind: input, shape index: {}]   ;;  %s1185_s5 = inlined_call_operand.vmem [shape: f32[4,384], index: 5, kind: input, shape index: {}]   ;;  %s1186_s6 = inlined_call_operand.vmem [shape: f32[8,384], index: 6, kind: output, shape index: {}]  }
   0x1   :  { %12 = vsyncpa [#allocation5], 0 }
   0x2   :  { %13 = vsyncpa [#allocation8], 0  ;;  %s1029_s21 = smov [#allocation4]   ;;  %s1030_s23 = smov [#allocation2]  }
   0x3   :  { %s33_s22 = sshll.u32 %s1029_s21, 4  ;;  %s21_s24 = sshll.u32 %s1030_s23, 4  ;;  %s34_s22 = int_to_ptr.vmem [resolvable:$true] %s33_s22  ;;  %s1077_s24 = int_to_ptr.vmem [resolvable:$true] %s21_s24 }
   0x4   :  { %s935_s27 = scalar_lea.hbm %s1182_s2, 2048 }
   0x5   :  { %p936_p0 = scmp.ne.s32.totalorder %s1182_s2, %s935_s27  ;;  %p939_p1 = scmp.lt.u32.totalorder %s935_s27, %s1182_s2 }
   0x7   :  { %p941_p2 = pnand %p939_p1, %p936_p0 }
   0x9   :  { %944 = shalt.err (!%p941_p2)
}
   0xa   :  { %s945_s8 = scalar_lea.vmem %s34_s22, 2048  ;;  %p950_p4 = scmp.lt.s32.totalorder %s34_s22, %s34_s22 }
   0xb   :  { %p946_p3 = scmp.ne.s32.totalorder %s34_s22, %s945_s8  ;;  %p951_p5 = scmp.lt.s32.totalorder %s945_s8, %s945_s8 }
   0xd   :  { %p952_p6 = por %p951_p5, %p950_p4 }
   0xf   :  { %p953_p7 = pnand %p952_p6, %p946_p3 }
  0x11   :  { %956 = shalt.err (!%p953_p7)
}
  0x12   :  { %s1031_s9 = smov 128   ;;  %s1032_s10 = smov 8  }
  0x13   :  { %39 = dma.hbm_to_vmem [thread:$0]  %s1182_s2, 2048, %s34_s22, [#allocation5], %s1031_s9, %s1031_s9, %s1032_s10  }
  0x14   :  { %s957_s15 = scalar_lea.hbm %s1181_s1, 256 }
  0x15   :  { %p958_p8 = scmp.ne.s32.totalorder %s1181_s1, %s957_s15  ;;  %p961_p9 = scmp.lt.u32.totalorder %s957_s15, %s1181_s1 }
  0x17   :  { %p963_p10 = pnand %p961_p9, %p958_p8 }
  0x19   :  { %966 = shalt.err (!%p963_p10)
}
  0x1a   :  { %s967_s20 = scalar_lea.vmem %s1077_s24, 256  ;;  %p972_p12 = scmp.lt.s32.totalorder %s1077_s24, %s1077_s24 }
  0x1b   :  { %p968_p11 = scmp.ne.s32.totalorder %s1077_s24, %s967_s20  ;;  %p973_p13 = scmp.lt.s32.totalorder %s967_s20, %s967_s20 }
  0x1d   :  { %p974_p0 = por %p973_p13, %p972_p12 }
  0x1f   :  { %p975_p1 = pnand %p974_p0, %p968_p11 }
  0x21   :  { %978 = shalt.err (!%p975_p1)
}
  0x22   :  { %27 = dma.hbm_to_vmem [thread:$0]  %s1181_s1, 256, %s1077_s24, [#allocation3], %s1031_s9, %s1031_s9, %s1032_s10  }
  0x23   :  { %s1033_s22 = smov [#allocation6]   ;;  %s979_s27 = scalar_lea.hbm %s1183_s3, 6144 }
  0x24   :  { %s45_s23 = sshll.u32 %s1033_s22, 4  ;;  %p980_p2 = scmp.ne.s32.totalorder %s1183_s3, %s979_s27  ;;  %s46_s23 = int_to_ptr.vmem [resolvable:$true] %s45_s23 }
  0x25   :  { %p983_p3 = scmp.lt.u32.totalorder %s979_s27, %s1183_s3 }
  0x27   :  { %p985_p4 = pnand %p983_p3, %p980_p2 }
  0x29   :  { %988 = shalt.err (!%p985_p4)
}
  0x2a   :  { %s989_s8 = scalar_lea.vmem %s46_s23, 6144  ;;  %p994_p6 = scmp.lt.s32.totalorder %s46_s23, %s46_s23 }
  0x2b   :  { %p990_p5 = scmp.ne.s32.totalorder %s46_s23, %s989_s8  ;;  %p995_p7 = scmp.lt.s32.totalorder %s989_s8, %s989_s8 }
  0x2d   :  { %p996_p8 = por %p995_p7, %p994_p6 }
  0x2f   :  { %p997_p9 = pnand %p996_p8, %p990_p5 }
  0x31   :  { %1000 = shalt.err (!%p997_p9)
}
  0x32   :  { %s1034_s1 = smov 384   ;;  %s1035_s24 = smov 24  }
  0x33   :  { %51 = dma.hbm_to_vmem [thread:$0]  %s1183_s3, 6144, %s46_s23, [#allocation5], %s1034_s1, %s1034_s1, %s1035_s24  }
  0x34   :  { %s1036_s11 = smov [#allocation7]   ;;  %s1001_s15 = scalar_lea.hbm %s1184_s4, 8192 }
  0x35   :  { %s57_s12 = sshll.u32 %s1036_s11, 4  ;;  %p1002_p10 = scmp.ne.s32.totalorder %s1184_s4, %s1001_s15  ;;  %s58_s12 = int_to_ptr.vmem [resolvable:$true] %s57_s12 }
  0x36   :  { %p1005_p11 = scmp.lt.u32.totalorder %s1001_s15, %s1184_s4 }
  0x38   :  { %p1007_p12 = pnand %p1005_p11, %p1002_p10 }
  0x3a   :  { %1010 = shalt.err (!%p1007_p12)
}
  0x3b   :  { %s1011_s20 = scalar_lea.vmem %s58_s12, 8192  ;;  %p1016_p0 = scmp.lt.s32.totalorder %s58_s12, %s58_s12 }
  0x3c   :  { %p1012_p13 = scmp.ne.s32.totalorder %s58_s12, %s1011_s20  ;;  %p1017_p1 = scmp.lt.s32.totalorder %s1011_s20, %s1011_s20 }
  0x3e   :  { %p1018_p2 = por %p1017_p1, %p1016_p0 }
  0x40   :  { %p1019_p3 = pnand %p1018_p2, %p1012_p13 }
  0x42   :  { %1022 = shalt.err (!%p1019_p3)
}
  0x43   :  { %s1037_s3 = smov 256   ;;  %s1038_s2 = smov 16  }
  0x44   :  { %63 = dma.hbm_to_vmem [thread:$0]  %s1184_s4, 8192, %s58_s12, [#allocation8], %s1037_s3, %s1037_s3, %s1038_s2  }
  0x45   :  { %1023 = dma.done.wait [#allocation3], 256  }
  0x46   :  { %1024 = vsyncadd [#allocation3], 4294967040 }
  0x47   :  { %1025 = dma.done.wait [#allocation5], 8192  }
  0x48   :  { %1026 = vsyncadd [#allocation5], 4294959104 }
  0x49   :  { %1027 = dma.done.wait [#allocation8], 8192  }
  0x4a   :  { %1028 = vsyncadd [#allocation8], 4294959104  ;;  %v1039_v0 = vmov 0.0|0.0   ;;  %vm1040_vm0 = vmmov 0   ;;  %v1041_v1 = vmov 0.0   ;;  %v85_v2 = vld [vmem:[#allocation2] sm:$0xff] }
  0x4b   :  { %763 = vmatprep.subr.bf16.mxu1 %v1039_v0  ;;  %690 = vmatprep.mubr.msk.f32.mxu1 %vm1040_vm0, %v1041_v1  ;;  %v86_v3 = vld [vmem:[#allocation2 + $0x8] sm:$0xff]  ;;  %v166_v5 = vld [vmem:[#allocation4] sm:$0xff]  ;;  %v167_v6 = vld [vmem:[#allocation4 + $0x8] sm:$0xff]  ;;  %vm91_vm1 = vcmask 130048  }
  0x4c   :  { %385 = vmatprep.mubr.f32.mxu0 %v1041_v1  ;;  %v764_v4 = vpack.c.bf16 %v86_v3, %v85_v2  ;;  %v78_v7 = vld [vmem:[%s1180_s0] sm:$0xff]  ;;  %v767_v8 = vpack.c.bf16 %v167_v6, %v166_v5  ;;  %v169_v10 = vld [vmem:[#allocation4 + $0x18] sm:$0xff]  ;;  %v170_v12 = vld [vmem:[#allocation4 + $0x20] sm:$0xff] }
  0x4d   :  { %v168_v9 = vld [vmem:[#allocation4 + $0x10] sm:$0xff]  ;;  %v171_v13 = vld [vmem:[#allocation4 + $0x28] sm:$0xff]  ;;  %v173_v16 = vld [vmem:[#allocation4 + $0x38] sm:$0xff] }
  0x4e   :  { %765 = vmatpush3.bf16.msra.mxu1 %v764_v4  ;;  %v770_v11 = vpack.c.bf16 %v169_v10, %v168_v9  ;;  %v773_v14 = vpack.c.bf16 %v171_v13, %v170_v12  ;;  %v172_v15 = vld [vmem:[#allocation4 + $0x30] sm:$0xff]  ;;  %v174_v18 = vld [vmem:[#allocation4 + $0x40] sm:$0xff]  ;;  %v175_v19 = vld [vmem:[#allocation4 + $0x48] sm:$0xff] }
  0x4f   :  { %766 = vmatprep.subr.bf16.mxu1 %v1039_v0  ;;  %v776_v17 = vpack.c.bf16 %v173_v16, %v172_v15  ;;  %v779_v20 = vpack.c.bf16 %v175_v19, %v174_v18  ;;  %v176_v21 = vld [vmem:[#allocation4 + $0x50] sm:$0xff]  ;;  %v177_v22 = vld [vmem:[#allocation4 + $0x58] sm:$0xff]  ;;  %v178_v24 = vld [vmem:[#allocation4 + $0x60] sm:$0xff] }
  0x50   :  { %v782_v23 = vpack.c.bf16 %v177_v22, %v176_v21  ;;  %v179_v25 = vld [vmem:[#allocation4 + $0x68] sm:$0xff]  ;;  %v180_v27 = vld [vmem:[#allocation4 + $0x70] sm:$0xff]  ;;  %v181_v28 = vld [vmem:[#allocation4 + $0x78] sm:$0xff] }
  0x51   :  { %691 = vmatmul.mubr.msk.f32.vlgmr.msra.gmra.mrb[0].mxu1 %vm91_vm1, %v78_v7  ;;  %v785_v26 = vpack.c.bf16 %v179_v25, %v178_v24  ;;  %v788_v29 = vpack.c.bf16 %v181_v28, %v180_v27  ;;  %v258_v30 = vld [vmem:[#allocation6 + $0x8] sm:$0xff]  ;;  %v261_v31 = vld [vmem:[#allocation6 + $0x20] sm:$0xff]  ;;  %v260_v34 = vld [vmem:[#allocation6 + $0x18] sm:$0xff] }
  0x52   :  { %768 = vmatpush3.bf16.msra.mxu1 %v767_v8  ;;  %725 = vmatprep.mubr.msk.f32.mxu1 %vm1040_vm0, %v1041_v1  ;;  %v257_v32 = vld [vmem:[#allocation6] sm:$0xff]  ;;  %v790_v33 = vpack.c.bf16 %v261_v31, %v258_v30  ;;  %v264_v36 = vld [vmem:[#allocation6 + $0x38] sm:$0xff]  ;;  %v267_v37 = vld [vmem:[#allocation6 + $0x50] sm:$0xff] }
  0x53   :  { %769 = vmatprep.subr.bf16.mxu1 %v1039_v0  ;;  %v792_v35 = vpack.c.bf16 %v260_v34, %v257_v32  ;;  %v263_v38 = vld [vmem:[#allocation6 + $0x30] sm:$0xff]  ;;  %v794_v39 = vpack.c.bf16 %v267_v37, %v264_v36  ;;  %v266_v40 = vld [vmem:[#allocation6 + $0x48] sm:$0xff]  ;;  %v273_v43 = vld [vmem:[#allocation6 + $0x80] sm:$0xff] }
  0x54   :  { %791 = vmatprep.subr.bf16.mxu0 %v790_v33  ;;  %v796_v41 = vpack.c.bf16 %v266_v40, %v263_v38  ;;  %v270_v42 = vld [vmem:[#allocation6 + $0x68] sm:$0xff]  ;;  %v269_v45 = vld [vmem:[#allocation6 + $0x60] sm:$0xff]  ;;  %v272_v46 = vld [vmem:[#allocation6 + $0x78] sm:$0xff] }
  0x55   :  { %793 = vmatpush1.bf16.msra.mxu0 %v792_v35  ;;  %v798_v44 = vpack.c.bf16 %v273_v43, %v270_v42  ;;  %v800_v47 = vpack.c.bf16 %v272_v46, %v269_v45  ;;  %v276_v48 = vld [vmem:[#allocation6 + $0x98] sm:$0xff]  ;;  %v279_v49 = vld [vmem:[#allocation6 + $0xb0] sm:$0xff]  ;;  %v278_v52 = vld [vmem:[#allocation6 + $0xa8] sm:$0xff] }
  0x56   :  { %771 = vmatpush3.bf16.msra.mxu1 %v770_v11  ;;  %795 = vmatprep.subr.bf16.mxu0 %v794_v39  ;;  %v802_v50 = vpack.c.bf16 %v279_v49, %v276_v48  ;;  %v275_v51 = vld [vmem:[#allocation6 + $0x90] sm:$0xff]  ;;  %v282_v54 = vld [vmem:[#allocation6 + $0xc8] sm:$0xff]  ;;  %v285_v55 = vld [vmem:[#allocation6 + $0xe0] sm:$0xff] }
  0x57   :  { %772 = vmatprep.subr.bf16.mxu1 %v1039_v0  ;;  %v804_v53 = vpack.c.bf16 %v278_v52, %v275_v51  ;;  %v806_v56 = vpack.c.bf16 %v285_v55, %v282_v54  ;;  %v281_v57 = vld [vmem:[#allocation6 + $0xc0] sm:$0xff]  ;;  %v284_v58 = vld [vmem:[#allocation6 + $0xd8] sm:$0xff]  ;;  %v291_v61 = vld [vmem:[#allocation6 + $0x110] sm:$0xff] }
  0x58   :  { %v808_v59 = vpack.c.bf16 %v284_v58, %v281_v57  ;;  %v288_v60 = vld [vmem:[#allocation6 + $0xf8] sm:$0xff]  ;;  %v287_v63 = vld [vmem:[#allocation6 + $0xf0] sm:$0xff]  ;;  %v290_v2 = vld [vmem:[#allocation6 + $0x108] sm:$0xff] }
  0x59   :  { %797 = vmatpush1.bf16.msra.mxu0 %v796_v41  ;;  %v810_v62 = vpack.c.bf16 %v291_v61, %v288_v60  ;;  %v812_v3 = vpack.c.bf16 %v290_v2, %v287_v63  ;;  %v294_v4 = vld [vmem:[#allocation6 + $0x128] sm:$0xff]  ;;  %v297_v5 = vld [vmem:[#allocation6 + $0x140] sm:$0xff]  ;;  %v296_v8 = vld [vmem:[#allocation6 + $0x138] sm:$0xff] }
  0x5a   :  { %774 = vmatpush3.bf16.msra.mxu1 %v773_v14  ;;  %799 = vmatprep.subr.bf16.mxu0 %v798_v44  ;;  %v814_v6 = vpack.c.bf16 %v297_v5, %v294_v4  ;;  %v293_v7 = vld [vmem:[#allocation6 + $0x120] sm:$0xff]  ;;  %v643_v10 = vld [vmem:[%s1185_s5] ss:$0 sm:$0xff]  ;;  %v262_v12 = vld [vmem:[#allocation6 + $0x28] sm:$0xff] }
  0x5b   :  { %775 = vmatprep.subr.bf16.mxu1 %v1039_v0  ;;  %v816_v9 = vpack.c.bf16 %v296_v8, %v293_v7  ;;  %v259_v11 = vld [vmem:[#allocation6 + $0x10] sm:$0xff]  ;;  %v265_v18 = vld [vmem:[#allocation6 + $0x40] sm:$0xff]  ;;  %v268_v19 = vld [vmem:[#allocation6 + $0x58] sm:$0xff] }
  0x5c   :  { %v823_v16 = vpack.c.bf16 %v262_v12, %v259_v11  ;;  %v271_v21 = vld [vmem:[#allocation6 + $0x70] sm:$0xff]  ;;  %v274_v22 = vld [vmem:[#allocation6 + $0x88] sm:$0xff]  ;;  %v277_v24 = vld [vmem:[#allocation6 + $0xa0] sm:$0xff] }
  0x5d   :  { %801 = vmatpush1.bf16.msra.mxu0 %v800_v47  ;;  %v280_v25 = vld [vmem:[#allocation6 + $0xb8] sm:$0xff]  ;;  %v283_v27 = vld [vmem:[#allocation6 + $0xd0] sm:$0xff]  ;;  %v286_v28 = vld [vmem:[#allocation6 + $0xe8] sm:$0xff] }
  0x5e   :  { %777 = vmatpush3.bf16.msra.mxu1 %v776_v17  ;;  %803 = vmatprep.subr.bf16.mxu0 %v802_v50  ;;  %v292_v30 = vld [vmem:[#allocation6 + $0x118] sm:$0xff]  ;;  %v295_v32 = vld [vmem:[#allocation6 + $0x130] sm:$0xff]  ;;  %v298_v33 = vld [vmem:[#allocation6 + $0x148] sm:$0xff] }
  0x5f   :  { %778 = vmatprep.subr.bf16.mxu1 %v1039_v0  ;;  %v841_v34 = vpack.c.bf16 %v298_v33, %v295_v32  ;;  %v300_v35 = vld [vmem:[#allocation6 + $0x158] sm:$0xff]  ;;  %v303_v36 = vld [vmem:[#allocation6 + $0x170] sm:$0xff]  ;;  %v302_v39 = vld [vmem:[#allocation6 + $0x168] sm:$0xff] }
  0x60   :  { %v818_v37 = vpack.c.bf16 %v303_v36, %v300_v35  ;;  %v299_v38 = vld [vmem:[#allocation6 + $0x150] sm:$0xff]  ;;  %v301_v40 = vld [vmem:[#allocation6 + $0x160] sm:$0xff]  ;;  %v304_v42 = vld [vmem:[#allocation6 + $0x178] sm:$0xff] }
  0x61   :  { %805 = vmatpush1.bf16.msra.mxu0 %v804_v53  ;;  %v820_v41 = vpack.c.bf16 %v302_v39, %v299_v38  ;;  %v844_v43 = vpack.c.bf16 %v304_v42, %v301_v40  ;;  %v466_v44 = vld [vmem:[#allocation7 + $0x8] sm:$0xff]  ;;  %v468_v45 = vld [vmem:[#allocation7 + $0x18] sm:$0xff]  ;;  %v465_v47 = vld [vmem:[#allocation7] sm:$0xff] }
  0x62   :  { %780 = vmatpush3.bf16.msra.mxu1 %v779_v20  ;;  %807 = vmatprep.subr.bf16.mxu0 %v806_v56  ;;  %v826_v20 = vpack.c.bf16 %v268_v19, %v265_v18  ;;  %v846_v46 = vpack.c.bf16 %v468_v45, %v466_v44  ;;  %v467_v48 = vld [vmem:[#allocation7 + $0x10] sm:$0xff]  ;;  %v470_v50 = vld [vmem:[#allocation7 + $0x28] sm:$0xff]  ;;  %v472_v51 = vld [vmem:[#allocation7 + $0x38] sm:$0xff] }
  0x63   :  { %781 = vmatprep.subr.bf16.mxu1 %v1039_v0  ;;  %v848_v54 = vpack.c.bf16 %v467_v48, %v465_v47  ;;  %v850_v56 = vpack.c.bf16 %v472_v51, %v470_v50  ;;  %v469_v57 = vld [vmem:[#allocation7 + $0x20] sm:$0xff]  ;;  %v471_v58 = vld [vmem:[#allocation7 + $0x30] sm:$0xff]  ;;  %v476_v60 = vld [vmem:[#allocation7 + $0x58] sm:$0xff] }
  0x64   :  { %v852_v61 = vpack.c.bf16 %v471_v58, %v469_v57  ;;  %v473_v63 = vld [vmem:[#allocation7 + $0x40] sm:$0xff]  ;;  %v475_v2 = vld [vmem:[#allocation7 + $0x50] sm:$0xff]  ;;  %v480_v4 = vld [vmem:[#allocation7 + $0x78] sm:$0xff] }
  0x65   :  { %809 = vmatpush1.bf16.msra.mxu0 %v808_v59  ;;  %v474_v59 = vld [vmem:[#allocation7 + $0x48] sm:$0xff]  ;;  %v856_v5 = vpack.c.bf16 %v475_v2, %v473_v63  ;;  %v477_v7 = vld [vmem:[#allocation7 + $0x60] sm:$0xff]  ;;  %v479_v8 = vld [vmem:[#allocation7 + $0x70] sm:$0xff] }
  0x66   :  { %783 = vmatpush3.bf16.msra.mxu1 %v782_v23  ;;  %811 = vmatprep.subr.bf16.mxu0 %v810_v62  ;;  %v829_v23 = vpack.c.bf16 %v274_v22, %v271_v21  ;;  %v854_v62 = vpack.c.bf16 %v476_v60, %v474_v59  ;;  %v860_v11 = vpack.c.bf16 %v479_v8, %v477_v7  ;;  %v485_v19 = vld [vmem:[#allocation7 + $0xa0] sm:$0xff]  ;;  %v490_v21 = vld [vmem:[#allocation7 + $0xc8] sm:$0xff]  ;;  %v492_v22 = vld [vmem:[#allocation7 + $0xd8] sm:$0xff] }
  0x67   :  { %784 = vmatprep.subr.bf16.mxu1 %v1039_v0  ;;  %v498_v32 = vld [vmem:[#allocation7 + $0x108] sm:$0xff]  ;;  %v500_v33 = vld [vmem:[#allocation7 + $0x118] sm:$0xff]  ;;  %v497_v36 = vld [vmem:[#allocation7 + $0x100] sm:$0xff] }
  0x68   :  { %v878_v35 = vpack.c.bf16 %v500_v33, %v498_v32  ;;  %v502_v38 = vld [vmem:[#allocation7 + $0x128] sm:$0xff]  ;;  %v504_v39 = vld [vmem:[#allocation7 + $0x138] sm:$0xff]  ;;  %v501_v42 = vld [vmem:[#allocation7 + $0x120] sm:$0xff] }
  0x69   :  { %813 = vmatpush1.bf16.msra.mxu0 %v812_v3  ;;  %v478_v3 = vld [vmem:[#allocation7 + $0x68] sm:$0xff]  ;;  %v508_v45 = vld [vmem:[#allocation7 + $0x158] sm:$0xff]  ;;  %v505_v47 = vld [vmem:[#allocation7 + $0x140] sm:$0xff] }
  0x6a   :  { %786 = vmatpush3.bf16.msra.mxu1 %v785_v26  ;;  %815 = vmatprep.subr.bf16.mxu0 %v814_v6  ;;  %v832_v26 = vpack.c.bf16 %v280_v25, %v277_v24  ;;  %v858_v6 = vpack.c.bf16 %v480_v4, %v478_v3  ;;  %v870_v24 = vpack.c.bf16 %v492_v22, %v490_v21  ;;  %v489_v25 = vld [vmem:[#allocation7 + $0xc0] sm:$0xff]  ;;  %v506_v44 = vld [vmem:[#allocation7 + $0x148] sm:$0xff]  ;;  %v507_v48 = vld [vmem:[#allocation7 + $0x150] sm:$0xff] }
  0x6b   :  { %787 = vmatprep.subr.bf16.mxu1 %v1039_v0  ;;  %v512_v50 = vld [vmem:[#allocation7 + $0x178] sm:$0xff]  ;;  %v888_v51 = vpack.c.bf16 %v507_v48, %v505_v47  ;;  %v513_v59 = vld [vmem:[#allocation7 + $0x180] sm:$0xff]  ;;  %v515_v60 = vld [vmem:[#allocation7 + $0x190] sm:$0xff] }
  0x6c   :  { %v896_v63 = vpack.c.bf16 %v515_v60, %v513_v59  ;;  %v517_v3 = vld [vmem:[#allocation7 + $0x1a0] sm:$0xff]  ;;  %v519_v4 = vld [vmem:[#allocation7 + $0x1b0] sm:$0xff] }
  0x6d   :  { %817 = vmatpush1.bf16.msra.mxu0 %v816_v9  ;;  %v482_v9 = vld [vmem:[#allocation7 + $0x88] sm:$0xff]  ;;  %v900_v7 = vpack.c.bf16 %v519_v4, %v517_v3  ;;  %v641_v22 = vld [vmem:[%s1185_s5 + $0x2] ss:$4 sm:$0x7] }
  0x6e   :  { %789 = vmatpush3.bf16.msra.mxu1 %v788_v29  ;;  %v835_v29 = vpack.c.bf16 %v286_v28, %v283_v27  ;;  %819 = vmatprep.subr.bf16.mxu0 %v818_v37  ;;  %v494_v27 = vld [vmem:[#allocation7 + $0xe8] sm:$0xff]  ;;  %v496_v28 = vld [vmem:[#allocation7 + $0xf8] sm:$0xff]  ;;  %v499_v37 = vld [vmem:[#allocation7 + $0x110] sm:$0xff] }
  0x6f   :  { %822 = vmatprep.subr.bf16.mxu1 %v1039_v0  ;;  %v880_v40 = vpack.c.bf16 %v499_v37, %v497_v36 }
  0x71   :  { %821 = vmatpush1.bf16.msra.mxu0 %v820_v41  ;;  %v882_v41 = vpack.c.bf16 %v504_v39, %v502_v38 }
  0x72   :  { %847 = vmatprep.subr.bf16.mxu0 %v846_v46 }
 0x124   :  { %v161_v13 = vpop.f32.mrb[0].mxu1 }
 0x125   :  { %v162_v14 = vadd.f32 %v643_v10, %v161_v13  ;;  %v692_v15 = vpop.f32.mrb[1].mxu1  ;;  %v484_v10 = vld [vmem:[#allocation7 + $0x98] sm:$0xff]  ;;  %v481_v13 = vld [vmem:[#allocation7 + $0x80] sm:$0xff] }
 0x126   :  { %v862_v12 = vpack.c.bf16 %v484_v10, %v482_v9  ;;  %v486_v15 = vld [vmem:[#allocation7 + $0xa8] sm:$0xff]  ;;  %v521_v9 = vld [vmem:[#allocation7 + $0x1c0] sm:$0xff]  ;;  %v523_v10 = vld [vmem:[#allocation7 + $0x1d0] sm:$0xff] }
 0x127   :  { %v165_v17 = vmax.f32 %v162_v14, 0.0  ;;  %v483_v14 = vld [vmem:[#allocation7 + $0x90] sm:$0xff] }
 0x129   :  { %726 = vmatmul.mubr.f32.vlgmr.msra.gmra.mrb[2].mxu1 %v165_v17  ;;  %v864_v17 = vpack.c.bf16 %v483_v14, %v481_v13  ;;  %v528_v13 = vld [vmem:[#allocation7 + $0x1f8] sm:$0xff] }
 0x12a   :  { %824 = vmatpush3.bf16.msra.mxu1 %v823_v16  ;;  %760 = vmatprep.mubr.msk.f32.mxu1 %vm1040_vm0, %v1041_v1  ;;  %v289_v1 = vld [vmem:[#allocation6 + $0x100] sm:$0xff]  ;;  %v488_v16 = vld [vmem:[#allocation7 + $0xb8] sm:$0xff] }
 0x12b   :  { %825 = vmatprep.subr.bf16.mxu1 %v1039_v0  ;;  %v838_v31 = vpack.c.bf16 %v292_v30, %v289_v1  ;;  %v866_v18 = vpack.c.bf16 %v488_v16, %v486_v15  ;;  %v874_v1 = vpack.c.bf16 %v496_v28, %v494_v27  ;;  %v493_v30 = vld [vmem:[#allocation7 + $0xe0] sm:$0xff]  ;;  %v527_v16 = vld [vmem:[#allocation7 + $0x1f0] sm:$0xff] }
 0x12c   :  { %v525_v15 = vld [vmem:[#allocation7 + $0x1e0] sm:$0xff] }
 0x12e   :  { %827 = vmatpush3.bf16.msra.mxu1 %v826_v20  ;;  %v487_v20 = vld [vmem:[#allocation7 + $0xb0] sm:$0xff] }
 0x12f   :  { %828 = vmatprep.subr.bf16.mxu1 %v1039_v0 }
 0x132   :  { %830 = vmatpush3.bf16.msra.mxu1 %v829_v23  ;;  %v868_v23 = vpack.c.bf16 %v487_v20, %v485_v19 }
 0x133   :  { %831 = vmatprep.subr.bf16.mxu1 %v1039_v0 }
 0x136   :  { %833 = vmatpush3.bf16.msra.mxu1 %v832_v26  ;;  %v491_v26 = vld [vmem:[#allocation7 + $0xd0] sm:$0xff] }
 0x137   :  { %834 = vmatprep.subr.bf16.mxu1 %v1039_v0 }
 0x13a   :  { %836 = vmatpush3.bf16.msra.mxu1 %v835_v29  ;;  %v872_v29 = vpack.c.bf16 %v491_v26, %v489_v25 }
 0x13b   :  { %837 = vmatprep.subr.bf16.mxu1 %v1039_v0 }
 0x13e   :  { %839 = vmatpush3.bf16.msra.mxu1 %v838_v31  ;;  %v495_v31 = vld [vmem:[#allocation7 + $0xf0] sm:$0xff] }
 0x13f   :  { %840 = vmatprep.subr.bf16.mxu1 %v1039_v0 }
 0x142   :  { %842 = vmatpush3.bf16.msra.mxu1 %v841_v34  ;;  %v876_v34 = vpack.c.bf16 %v495_v31, %v493_v30 }
 0x143   :  { %843 = vmatprep.subr.bf16.mxu1 %v1039_v0  ;;  %v645_v0 = vld [vmem:[%s1185_s5 + $0x1] ss:$0 sm:$0xff] }
 0x146   :  { %845 = vmatpush3.bf16.msra.mxu1 %v844_v43  ;;  %v503_v43 = vld [vmem:[#allocation7 + $0x130] sm:$0xff] }
 0x147   :  { %v884_v46 = vpack.c.bf16 %v503_v43, %v501_v42 }
 0x1fc   :  { %v252_v49 = vpop.f32.mrb[2].mxu1 }
 0x1fd   :  { %v253_v52 = vadd.f32 %v645_v0, %v252_v49  ;;  %v727_v53 = vpop.f32.mrb[3].mxu1  ;;  %v886_v0 = vpack.c.bf16 %v508_v45, %v506_v44  ;;  %v510_v49 = vld [vmem:[#allocation7 + $0x168] sm:$0xff] }
 0x1fe   :  { %v509_v53 = vld [vmem:[#allocation7 + $0x160] sm:$0xff] }
 0x1ff   :  { %v256_v55 = vmax.f32 %v253_v52, 0.0  ;;  %v890_v52 = vpack.c.bf16 %v512_v50, %v510_v49 }
 0x201   :  { %386 = vmatmul.mubr.f32.vlgmr.msra.gmra.mrb[0].mxu0 %v256_v55  ;;  %761 = vmatmul.mubr.f32.vlgmr.msra.gmra.mrb[4].mxu1 %v256_v55  ;;  %v514_v55 = vld [vmem:[#allocation7 + $0x188] sm:$0xff] }
 0x202   :  { %849 = vmatpush1.bf16.msra.mxu0 %v848_v54  ;;  %v511_v54 = vld [vmem:[#allocation7 + $0x170] sm:$0xff] }
 0x203   :  { %851 = vmatprep.subr.bf16.mxu0 %v850_v56  ;;  %v516_v56 = vld [vmem:[#allocation7 + $0x198] sm:$0xff]  ;;  %v892_v57 = vpack.c.bf16 %v511_v54, %v509_v53 }
 0x204   :  { %v894_v58 = vpack.c.bf16 %v516_v56, %v514_v55 }
 0x206   :  { %853 = vmatpush1.bf16.msra.mxu0 %v852_v61  ;;  %v518_v61 = vld [vmem:[#allocation7 + $0x1a8] sm:$0xff] }
 0x207   :  { %855 = vmatprep.subr.bf16.mxu0 %v854_v62  ;;  %v520_v62 = vld [vmem:[#allocation7 + $0x1b8] sm:$0xff] }
 0x208   :  { %v898_v2 = vpack.c.bf16 %v520_v62, %v518_v61 }
 0x20a   :  { %857 = vmatpush1.bf16.msra.mxu0 %v856_v5  ;;  %v522_v5 = vld [vmem:[#allocation7 + $0x1c8] sm:$0xff] }
 0x20b   :  { %859 = vmatprep.subr.bf16.mxu0 %v858_v6  ;;  %v524_v6 = vld [vmem:[#allocation7 + $0x1d8] sm:$0xff] }
 0x20c   :  { %v902_v8 = vpack.c.bf16 %v524_v6, %v522_v5 }
 0x20e   :  { %861 = vmatpush1.bf16.msra.mxu0 %v860_v11  ;;  %v904_v11 = vpack.c.bf16 %v523_v10, %v521_v9 }
 0x20f   :  { %863 = vmatprep.subr.bf16.mxu0 %v862_v12  ;;  %v526_v12 = vld [vmem:[#allocation7 + $0x1e8] sm:$0xff] }
 0x210   :  { %v906_v14 = vpack.c.bf16 %v528_v13, %v526_v12 }
 0x212   :  { %865 = vmatpush1.bf16.msra.mxu0 %v864_v17  ;;  %v908_v17 = vpack.c.bf16 %v527_v16, %v525_v15 }
 0x213   :  { %867 = vmatprep.subr.bf16.mxu0 %v866_v18  ;;  %v306_v18 = vlaneseq }
 0x215   :  { %v307_v19 = vshrl.u32 %v306_v18, 7 }
 0x216   :  { %869 = vmatpush1.bf16.msra.mxu0 %v868_v23 }
 0x217   :  { %871 = vmatprep.subr.bf16.mxu0 %v870_v24  ;;  %v308_v20 = vsub.s32 0, %v307_v19  ;;  %v316_v21 = vsub.s32 2, %v307_v19  ;;  %v312_v23 = vsub.s32 1, %v307_v19 }
 0x219   :  { %v309_v24 = vrot.slane %v641_v22, %v308_v20  ;;  %v317_v25 = vrot.slane %v641_v22, %v316_v21  ;;  %v313_v26 = vrot.slane %v641_v22, %v312_v23 }
 0x21a   :  { %873 = vmatpush1.bf16.msra.mxu0 %v872_v29 }
 0x21b   :  { %875 = vmatprep.subr.bf16.mxu0 %v874_v1 }
 0x21e   :  { %877 = vmatpush1.bf16.msra.mxu0 %v876_v34 }
 0x21f   :  { %879 = vmatprep.subr.bf16.mxu0 %v878_v35 }
 0x222   :  { %881 = vmatpush1.bf16.msra.mxu0 %v880_v40  ;;  %v642_v40 = vld [vmem:[%s1185_s5 + $0x3] ss:$4 sm:$0x3] }
 0x223   :  { %883 = vmatprep.subr.bf16.mxu0 %v882_v41  ;;  %v533_v41 = vrot.slane %v642_v40, %v308_v20  ;;  %v537_v42 = vrot.slane %v642_v40, %v312_v23 }
 0x226   :  { %885 = vmatpush1.bf16.msra.mxu0 %v884_v46 }
 0x227   :  { %887 = vmatprep.subr.bf16.mxu0 %v886_v0 }
 0x22a   :  { %889 = vmatpush1.bf16.msra.mxu0 %v888_v51 }
 0x22b   :  { %891 = vmatprep.subr.bf16.mxu0 %v890_v52 }
 0x22e   :  { %893 = vmatpush1.bf16.msra.mxu0 %v892_v57 }
 0x22f   :  { %895 = vmatprep.subr.bf16.mxu0 %v894_v58 }
 0x232   :  { %897 = vmatpush1.bf16.msra.mxu0 %v896_v63 }
 0x233   :  { %899 = vmatprep.subr.bf16.mxu0 %v898_v2 }
 0x236   :  { %901 = vmatpush1.bf16.msra.mxu0 %v900_v7 }
 0x237   :  { %903 = vmatprep.subr.bf16.mxu0 %v902_v8 }
 0x23a   :  { %905 = vmatpush1.bf16.msra.mxu0 %v904_v11 }
 0x23b   :  { %907 = vmatprep.subr.bf16.mxu0 %v906_v14 }
 0x23e   :  { %909 = vmatpush1.bf16.msra.mxu0 %v908_v17 }
 0x2d4   :  { %v387_v27 = vpop.f32.mrb[0].mxu0  ;;  %v458_v28 = vpop.f32.mrb[4].mxu1 }
 0x2d5   :  { %v388_v29 = vadd.f32 %v387_v27, %v309_v24  ;;  %v459_v1 = vadd.f32 %v458_v28, %v317_v25  ;;  %v389_v30 = vpop.f32.mrb[1].mxu0  ;;  %v762_v31 = vpop.f32.mrb[5].mxu1 }
 0x2d6   :  { %v390_v32 = vadd.f32 %v389_v30, %v313_v26 }
 0x2d7   :  { %v464_v33 = vmax.f32 %v459_v1, 0.0  ;;  %v462_v35 = vmax.f32 %v388_v29, 0.0 }
 0x2d8   :  { %v463_v34 = vmax.f32 %v390_v32, 0.0 }
 0x2d9   :  { %v648_v36 = vmul.f32 -1.442695, %v464_v33 }
 0x2da   :  { %604 = vmatprep.mubr.f32.mxu0 %v463_v34 }
 0x2db   :  { %923 = vpow2.f32 %v648_v36  ;;  %605 = vmatmul.mubr.f32.vlgmr.msra.gmra.mrb[2].mxu0 %v462_v35 }
 0x2e5   :  { %v924_v37 = vpop.eup %923 }
 0x2e6   :  { %v624_v38 = vadd.f32 1.0, %v924_v37 }
 0x2e8   :  { %925 = vrcp.f32 %v624_v38 }
 0x2f2   :  { %v926_v39 = vpop.eup %925 }
 0x2f3   :  { %633 = vst [vmem:[%s1186_s6 + $0x10] sm:$0xff] %v926_v39 }
 0x3ae   :  { %v606_v43 = vpop.f32.mrb[2].mxu0 }
 0x3af   :  { %v607_v44 = vadd.f32 %v606_v43, %v533_v41  ;;  %v608_v45 = vpop.f32.mrb[3].mxu0 }
 0x3b0   :  { %v609_v46 = vadd.f32 %v608_v45, %v537_v42 }
 0x3b1   :  { %v611_v0 = vmax.f32 %v607_v44, 0.0 }
 0x3b2   :  { %v612_v47 = vmax.f32 %v609_v46, 0.0 }
 0x3b3   :  { %v646_v48 = vmul.f32 -1.442695, %v611_v0 }
 0x3b4   :  { %v647_v49 = vmul.f32 -1.442695, %v612_v47 }
 0x3b5   :  { %927 = vpow2.f32 %v646_v48 }
 0x3b6   :  { %929 = vpow2.f32 %v647_v49 }
 0x3bf   :  { %v928_v50 = vpop.eup %927 }
 0x3c0   :  { %v930_v51 = vpop.eup %929  ;;  %v622_v52 = vadd.f32 1.0, %v928_v50 }
 0x3c1   :  { %v623_v53 = vadd.f32 1.0, %v930_v51 }
 0x3c2   :  { %931 = vrcp.f32 %v622_v52 }
 0x3c3   :  { %933 = vrcp.f32 %v623_v53 }
 0x3cc   :  { %v932_v54 = vpop.eup %931 }
 0x3cd   :  { %v934_v55 = vpop.eup %933  ;;  %631 = vst [vmem:[%s1186_s6] sm:$0xff] %v932_v54 }
 0x3ce   :  { %632 = vst [vmem:[%s1186_s6 + $0x8] sm:$0xff] %v934_v55 }
 0x3cf   :  { %638 = vsyncpa [#allocation3], 1 }
 0x3d0   :  { %639 = vsyncpa [#allocation5], 1 }
 0x3d1   :  { %640 = vsyncpa [#allocation8], 1 }

</bundles_post_ra>
